<compile_context>
chip_gen: v7x
topology: tpu7x:2x2x1
jax: 0.10.0
libtpu: 0.0.40
codegen_flags: <defaults>
</compile_context>

<pallas_src>
import math

import jax
import jax.numpy as jnp
from jax import lax
from jax.experimental import pallas as pl
from jax.experimental.pallas import tpu as pltpu

_NUM_CLASSES = 10
_HEAD_ROWS = 16            # packed pre-path output rows: [en, y0..y9, pad*5]


def _rup(x, m):
    return ((x + m - 1) // m) * m


def _leaky(x, slope=0.1):
    # identical to LeakyReLU(0.1) for slope < 1; avoids compare+select
    return jnp.maximum(x, slope * x)


def _featureT(zT_ref, w1T_ref, b1c_ref, w2T_ref, b2c_ref):
    """feature MLP in batch-on-lanes layout: returns hT of shape (ndf, tb)."""
    x = zT_ref[...].astype(jnp.float32)                                   # (nz, tb)
    h = jnp.dot(w1T_ref[...], x, preferred_element_type=jnp.float32) + b1c_ref[...]
    h = _leaky(h)
    h = jnp.dot(w2T_ref[...], h, preferred_element_type=jnp.float32) + b2c_ref[...]
    return _leaky(h)                                                      # (ndf, tb)


def _netE_energy_kernel(zT_ref, w1T_ref, b1c_ref, w2T_ref, b2c_ref,
                        weT_ref, be_ref, out_ref):
    """pre=False path: feature -> ebm_head.  Output is a (1, tb) lane-dense row."""
    h = _featureT(zT_ref, w1T_ref, b1c_ref, w2T_ref, b2c_ref)
    en = jnp.dot(weT_ref[...], h, preferred_element_type=jnp.float32) + be_ref[0]
    out_ref[...] = en.astype(out_ref.dtype)                               # (1, tb)


def _netE_pre_kernel(zT_ref, w1T_ref, b1c_ref, w2T_ref, b2c_ref,
                     wcT_ref, bcc_ref, w4e_ref, b4c_ref, out_ref):
    """pre=True path: feature -> fused {ebm_head, pre_head} packed (16, tb) slab."""
    h = _featureT(zT_ref, w1T_ref, b1c_ref, w2T_ref, b2c_ref)            # (ndf, tb)

    # combined head: row 0 = we (energy, be folded into bcc row 0),
    # rows 1..ndf = w3 (pre_head first Linear), remaining rows = zero padding.
    c = jnp.dot(wcT_ref[...], h, preferred_element_type=jnp.float32) + bcc_ref[...]
    row = lax.broadcasted_iota(jnp.int32, (c.shape[0], 1), 0)
    p = jnp.where(row >= 1, _leaky(c), c)      # leaky only the pre_head rows

    # final head: row 0 = 1.0 selector (passes en through untouched),
    # rows 1..10 = w4^T (column 0 zero so the en row does not contribute).
    out = jnp.dot(w4e_ref[...], p, preferred_element_type=jnp.float32) + b4c_ref[...]
    out_ref[...] = out.astype(out_ref.dtype)                              # (16, tb)


def init_params(key, num_latent):
    """Deterministic PyTorch-Linear-style init: U(-1/sqrt(fan_in), 1/sqrt(fan_in))."""
    ndf = num_latent * 2

    def lin(k, fan_in, fan_out):
        kw, kb = jax.random.split(k)
        bound = 1.0 / math.sqrt(fan_in)
        w = jax.random.uniform(kw, (fan_in, fan_out), jnp.float32, -bound, bound)
        b = jax.random.uniform(kb, (1, fan_out), jnp.float32, -bound, bound)
        return w, b

    ks = jax.random.split(key, 5)
    w1, b1 = lin(ks[0], num_latent, ndf)   # feature[0]
    w2, b2 = lin(ks[1], ndf, ndf)          # feature[2]
    we, be = lin(ks[2], ndf, 1)            # ebm_head[0]
    w3, b3 = lin(ks[3], ndf, ndf)          # pre_head[0]
    w4, b4 = lin(ks[4], ndf, 10)           # pre_head[2]
    return dict(w1=w1, b1=b1, w2=w2, b2=b2, we=we, be=be,
                w3=w3, b3=b3, w4=w4, b4=b4)


def _batch_tiling(B, block_b, min_tiles=2):
    """Lane-aligned batch tiles (multiples of 128); prefer >=2 tiles for v7x."""
    block_b = max(128, (block_b // 128) * 128)
    b_lanes = _rup(B, 128)
    tb = min(block_b, b_lanes)
    if b_lanes // tb < min_tiles and b_lanes >= min_tiles * 128:
        # split so both v7x TensorCores get a tile (harmless on v5e/v6e)
        tb = _rup(-(-b_lanes // min_tiles), 128)
    B_pad = _rup(B, tb)
    return tb, B_pad


def netE_forward(z, params, pre=False, block_b=2048):
    """z: (B, nz, 1, 1) or (B, nz). Returns en (B,1) or (en, y) if pre."""
    z2d = z.reshape(z.shape[0], -1)          # == z.squeeze() for trailing 1,1 dims
    B, nz = z2d.shape
    ndf = params["w1"].shape[1]
    f32 = jnp.float32

    tb, B_pad = _batch_tiling(B, block_b)
    zT = z2d.T.astype(f32)                   # batch on lanes: (nz, B)
    if B_pad != B:
        zT = jnp.pad(zT, ((0, 0), (0, B_pad - B)))
    grid = (B_pad // tb,)

    # transposed weights / column biases (grid-invariant blocks)
    w1T = params["w1"].T.astype(f32)                       # (ndf, nz)
    b1c = params["b1"].reshape(ndf, 1).astype(f32)
    w2T = params["w2"].T.astype(f32)                       # (ndf, ndf)
    b2c = params["b2"].reshape(ndf, 1).astype(f32)

    full = lambda shape: pl.BlockSpec(shape, lambda i: (0, 0))
    z_spec = pl.BlockSpec((nz, tb), lambda i: (0, i))
    cparams = pltpu.CompilerParams(dimension_semantics=("parallel",))

    if pre:
        wc_rows = _rup(1 + ndf, 8)          # sublane-aligned combined head rows
        # combined head: row 0 = we^T, rows 1..ndf = w3^T (zeros elsewhere)
        wcT = jnp.zeros((wc_rows, ndf), f32)
        wcT = wcT.at[0, :].set(params["we"].reshape(ndf).astype(f32))
        wcT = wcT.at[1:1 + ndf, :].set(params["w3"].T.astype(f32))
        bcc = jnp.zeros((wc_rows, 1), f32)
        bcc = bcc.at[0, 0].set(params["be"][0, 0].astype(f32))
        bcc = bcc.at[1:1 + ndf, 0].set(params["b3"].reshape(ndf).astype(f32))

        # final head: row 0 passes en through; rows 1..10 = w4^T on cols 1..ndf
        w4e = jnp.zeros((_HEAD_ROWS, wc_rows), f32)
        w4e = w4e.at[0, 0].set(1.0)
        w4e = w4e.at[1:1 + _NUM_CLASSES, 1:1 + ndf].set(params["w4"].T.astype(f32))
        b4c = jnp.zeros((_HEAD_ROWS, 1), f32)
        b4c = b4c.at[1:1 + _NUM_CLASSES, 0].set(params["b4"].reshape(-1).astype(f32))

        out = pl.pallas_call(
            _netE_pre_kernel,
            out_shape=jax.ShapeDtypeStruct((_HEAD_ROWS, B_pad), jnp.float32),
            grid_spec=pltpu.PrefetchScalarGridSpec(
                num_scalar_prefetch=0,
                grid=grid,
                in_specs=[
                    z_spec,                                     # zT tile
                    full((ndf, nz)), full((ndf, 1)),            # w1T, b1c
                    full((ndf, ndf)), full((ndf, 1)),           # w2T, b2c
                    full((wc_rows, ndf)), full((wc_rows, 1)),   # [we|w3]^T, [be|b3]
                    full((_HEAD_ROWS, wc_rows)),                # selector|w4^T
                    full((_HEAD_ROWS, 1)),                      # [0|b4]
                ],
                out_specs=pl.BlockSpec((_HEAD_ROWS, tb), lambda i: (0, i)),
            ),
            compiler_params=cparams,
        )(zT, w1T, b1c, w2T, b2c, wcT, bcc, w4e, b4c)

        en = out[0, :B].reshape(B, 1)
        y = out[1:1 + _NUM_CLASSES, :B].T
        return en, y

    # pre=False: energy-only kernel (no pre_head compute, no w3/w4 DMA)
    weT = params["we"].reshape(1, ndf).astype(f32)
    be_s = params["be"].reshape(1).astype(f32)       # scalar -> SMEM

    out = pl.pallas_call(
        _netE_energy_kernel,
        out_shape=jax.ShapeDtypeStruct((1, B_pad), jnp.float32),
        grid_spec=pltpu.PrefetchScalarGridSpec(
            num_scalar_prefetch=0,
            grid=grid,
            in_specs=[
                z_spec,                                          # zT tile
                full((ndf, nz)), full((ndf, 1)),                 # w1T, b1c
                full((ndf, ndf)), full((ndf, 1)),                # w2T, b2c
                full((1, ndf)),                                  # weT row
                pl.BlockSpec(memory_space=pltpu.MemorySpace.SMEM),  # be scalar
            ],
            out_specs=pl.BlockSpec((1, tb), lambda i: (0, i)),
        ),
        compiler_params=cparams,
    )(zT, w1T, b1c, w2T, b2c, weT, be_s)

    return out[0, :B].reshape(B, 1)


def _reference(z, params, pre=False):
    z2d = z.reshape(z.shape[0], -1)
    lk = lambda x: jnp.where(x > 0, x, 0.1 * x)
    h = lk(z2d @ params["w1"] + params["b1"])
    h = lk(h @ params["w2"] + params["b2"])
    en = (h @ params["we"] + params["be"]).reshape(-1, 1)
    if pre:
        p = lk(h @ params["w3"] + params["b3"])
        y = p @ params["w4"] + params["b4"]
        return en, y
    return en


if __name__ == "__main__":
    key = jax.random.PRNGKey(0)
    k_param, k_z, k_z2 = jax.random.split(key, 3)

    num_latent = 16           # args.num_latent  -> ndf = 32
    B = 64

    params = init_params(k_param, num_latent)
    z = jax.random.normal(k_z, (B, num_latent, 1, 1), jnp.float32)

    # pre=True path
    en, y = netE_forward(z, params, pre=True)
    jax.block_until_ready((en, y))
    en_ref, y_ref = _reference(z, params, pre=True)
    assert en.shape == (B, 1) and y.shape == (B, 10)
    assert jnp.allclose(en, en_ref, atol=1e-5, rtol=1e-5)
    assert jnp.allclose(y, y_ref, atol=1e-5, rtol=1e-5)

    # pre=False path (energy-only kernel, be via SMEM)
    en_only = netE_forward(z, params, pre=False)
    jax.block_until_ready(en_only)
    assert jnp.allclose(en_only, en_ref, atol=1e-5, rtol=1e-5)

    # ragged / multi-tile path: B=300 with 128-lane tiles -> 3 grid steps + padding
    B2 = 300
    z2 = jax.random.normal(k_z2, (B2, num_latent, 1, 1), jnp.float32)
    en2, y2 = netE_forward(z2, params, pre=True, block_b=128)
    en2_only = netE_forward(z2, params, pre=False, block_b=128)
    jax.block_until_ready((en2, y2, en2_only))
    en2_ref, y2_ref = _reference(z2, params, pre=True)
    assert en2.shape == (B2, 1) and y2.shape == (B2, 10)
    assert jnp.allclose(en2, en2_ref, atol=1e-5, rtol=1e-5)
    assert jnp.allclose(y2, y2_ref, atol=1e-5, rtol=1e-5)
    assert jnp.allclose(en2_only, en2_ref, atol=1e-5, rtol=1e-5)

    # default tiling on a single-tile-sized batch still yields a >=2-step
    # parallel grid (v7x megacore); verify correctness there too.
    en3, y3 = netE_forward(z2, params, pre=True)   # block_b=2048 -> 2x256 tiles
    jax.block_until_ready((en3, y3))
    assert jnp.allclose(en3, en2_ref, atol=1e-5, rtol=1e-5)
    assert jnp.allclose(y3, y2_ref, atol=1e-5, rtol=1e-5)

    print("KERNEL_OK")
</pallas_src>

<mosaic_0001>
module attributes {stable_mosaic.version = 11 : i64} {
  func.func @_netE_pre_kernel(%arg0: i32, %arg1: memref<16x128xf32, #tpu.memory_space<vmem>>, %arg2: memref<32x16xf32, #tpu.memory_space<vmem>>, %arg3: memref<32x1xf32, #tpu.memory_space<vmem>>, %arg4: memref<32x32xf32, #tpu.memory_space<vmem>>, %arg5: memref<32x1xf32, #tpu.memory_space<vmem>>, %arg6: memref<40x32xf32, #tpu.memory_space<vmem>>, %arg7: memref<40x1xf32, #tpu.memory_space<vmem>>, %arg8: memref<16x40xf32, #tpu.memory_space<vmem>>, %arg9: memref<16x1xf32, #tpu.memory_space<vmem>>, %arg10: memref<16x128xf32, #tpu.memory_space<vmem>>) attributes {dimension_semantics = [#tpu.dimension_semantics<parallel>], iteration_bounds = array<i64: 1>, scalar_prefetch = 0 : i64, scratch_operands = 0 : i64, tpu.core_type = #tpu.core_type<tc>, window_params = [{transform_indices = @transform_0, window_bounds = array<i64: 16, 128>}, {pipeline_mode = #tpu.pipeline_mode<synchronous>, transform_indices = @transform_1, window_bounds = array<i64: 32, 16>}, {pipeline_mode = #tpu.pipeline_mode<synchronous>, transform_indices = @transform_2, window_bounds = array<i64: 32, 1>}, {pipeline_mode = #tpu.pipeline_mode<synchronous>, transform_indices = @transform_3, window_bounds = array<i64: 32, 32>}, {pipeline_mode = #tpu.pipeline_mode<synchronous>, transform_indices = @transform_4, window_bounds = array<i64: 32, 1>}, {pipeline_mode = #tpu.pipeline_mode<synchronous>, transform_indices = @transform_5, window_bounds = array<i64: 40, 32>}, {pipeline_mode = #tpu.pipeline_mode<synchronous>, transform_indices = @transform_6, window_bounds = array<i64: 40, 1>}, {pipeline_mode = #tpu.pipeline_mode<synchronous>, transform_indices = @transform_7, window_bounds = array<i64: 16, 40>}, {pipeline_mode = #tpu.pipeline_mode<synchronous>, transform_indices = @transform_8, window_bounds = array<i64: 16, 1>}, {transform_indices = @transform_9, window_bounds = array<i64: 16, 128>}]} {
    %c0 = arith.constant 0 : index
    %c0_0 = arith.constant 0 : index
    %0 = vector.load %arg1[%c0, %c0_0] : memref<16x128xf32, #tpu.memory_space<vmem>>, vector<16x128xf32>
    %c0_1 = arith.constant 0 : index
    %c0_2 = arith.constant 0 : index
    %1 = vector.load %arg2[%c0_1, %c0_2] : memref<32x16xf32, #tpu.memory_space<vmem>>, vector<32x16xf32>
    %cst = arith.constant dense<0.000000e+00> : vector<32x128xf32>
    %2 = tpu.matmul %1, %0, %cst {dimension_numbers = #tpu.dot_dimension_numbers<[1], [0], [0], [1], [0, 0, 1, 1], [], []>} : vector<32x16xf32>, vector<16x128xf32>, vector<32x128xf32> -> vector<32x128xf32>
    %c0_3 = arith.constant 0 : index
    %c0_4 = arith.constant 0 : index
    %3 = vector.load %arg3[%c0_3, %c0_4] : memref<32x1xf32, #tpu.memory_space<vmem>>, vector<32x1xf32>
    %4 = vector.broadcast %3 : vector<32x1xf32> to vector<32x128xf32>
    %5 = arith.addf %2, %4 : vector<32x128xf32>
    %cst_5 = arith.constant 1.000000e-01 : f32
    %6 = vector.broadcast %cst_5 : f32 to vector<32x128xf32>
    %7 = arith.mulf %6, %5 : vector<32x128xf32>
    %8 = arith.maximumf %5, %7 : vector<32x128xf32>
    %c0_6 = arith.constant 0 : index
    %c0_7 = arith.constant 0 : index
    %9 = vector.load %arg4[%c0_6, %c0_7] : memref<32x32xf32, #tpu.memory_space<vmem>>, vector<32x32xf32>
    %cst_8 = arith.constant dense<0.000000e+00> : vector<32x128xf32>
    %10 = tpu.matmul %9, %8, %cst_8 {dimension_numbers = #tpu.dot_dimension_numbers<[1], [0], [0], [1], [0, 0, 1, 1], [], []>} : vector<32x32xf32>, vector<32x128xf32>, vector<32x128xf32> -> vector<32x128xf32>
    %c0_9 = arith.constant 0 : index
    %c0_10 = arith.constant 0 : index
    %11 = vector.load %arg5[%c0_9, %c0_10] : memref<32x1xf32, #tpu.memory_space<vmem>>, vector<32x1xf32>
    %12 = vector.broadcast %11 : vector<32x1xf32> to vector<32x128xf32>
    %13 = arith.addf %10, %12 : vector<32x128xf32>
    %cst_11 = arith.constant 1.000000e-01 : f32
    %14 = vector.broadcast %cst_11 : f32 to vector<32x128xf32>
    %15 = arith.mulf %14, %13 : vector<32x128xf32>
    %16 = arith.maximumf %13, %15 : vector<32x128xf32>
    %c0_12 = arith.constant 0 : index
    %c0_13 = arith.constant 0 : index
    %17 = vector.load %arg6[%c0_12, %c0_13] : memref<40x32xf32, #tpu.memory_space<vmem>>, vector<40x32xf32>
    %cst_14 = arith.constant dense<0.000000e+00> : vector<40x128xf32>
    %18 = tpu.matmul %17, %16, %cst_14 {dimension_numbers = #tpu.dot_dimension_numbers<[1], [0], [0], [1], [0, 0, 1, 1], [], []>} : vector<40x32xf32>, vector<32x128xf32>, vector<40x128xf32> -> vector<40x128xf32>
    %c0_15 = arith.constant 0 : index
    %c0_16 = arith.constant 0 : index
    %19 = vector.load %arg7[%c0_15, %c0_16] : memref<40x1xf32, #tpu.memory_space<vmem>>, vector<40x1xf32>
    %20 = vector.broadcast %19 : vector<40x1xf32> to vector<40x128xf32>
    %21 = arith.addf %18, %20 : vector<40x128xf32>
    %22 = tpu.iota {dimensions = array<i32: 0>} : vector<40x1xi32>
    %c1_i32 = arith.constant 1 : i32
    %23 = vector.broadcast %c1_i32 : i32 to vector<40x1xi32>
    %24 = arith.cmpi sge, %22, %23 : vector<40x1xi32>
    %cst_17 = arith.constant 1.000000e-01 : f32
    %25 = vector.broadcast %cst_17 : f32 to vector<40x128xf32>
    %26 = arith.mulf %25, %21 : vector<40x128xf32>
    %27 = arith.maximumf %21, %26 : vector<40x128xf32>
    %28 = vector.shape_cast %24 : vector<40x1xi1> to vector<40x1xi1>
    %29 = vector.broadcast %28 : vector<40x1xi1> to vector<40x128xi1>
    %30 = arith.select %29, %27, %21 : vector<40x128xi1>, vector<40x128xf32>
    %c0_18 = arith.constant 0 : index
    %c0_19 = arith.constant 0 : index
    %31 = vector.load %arg8[%c0_18, %c0_19] : memref<16x40xf32, #tpu.memory_space<vmem>>, vector<16x40xf32>
    %cst_20 = arith.constant dense<0.000000e+00> : vector<16x128xf32>
    %32 = tpu.matmul %31, %30, %cst_20 {dimension_numbers = #tpu.dot_dimension_numbers<[1], [0], [0], [1], [0, 0, 1, 1], [], []>} : vector<16x40xf32>, vector<40x128xf32>, vector<16x128xf32> -> vector<16x128xf32>
    %c0_21 = arith.constant 0 : index
    %c0_22 = arith.constant 0 : index
    %33 = vector.load %arg9[%c0_21, %c0_22] : memref<16x1xf32, #tpu.memory_space<vmem>>, vector<16x1xf32>
    %34 = vector.broadcast %33 : vector<16x1xf32> to vector<16x128xf32>
    %35 = arith.addf %32, %34 : vector<16x128xf32>
    %c0_23 = arith.constant 0 : index
    %c0_24 = arith.constant 0 : index
    %36 = vector.load %arg10[%c0_23, %c0_24] : memref<16x128xf32, #tpu.memory_space<vmem>>, vector<16x128xf32>
    tpu.vector_store %arg10[%c0_23, %c0_24], %35 {strides = array<i32>} : memref<16x128xf32, #tpu.memory_space<vmem>>, vector<16x128xf32>,
    return
  }
  func.func @transform_0(%arg0: i32) -> (i32, i32) {
    %c0_i32 = arith.constant 0 : i32
    %c0_i32_0 = arith.constant 0 : i32
    return %c0_i32, %arg0 : i32, i32
  }
  func.func @transform_1(%arg0: i32) -> (i32, i32) {
    %c0_i32 = arith.constant 0 : i32
    %c0_i32_0 = arith.constant 0 : i32
    %c0_i32_1 = arith.constant 0 : i32
    return %c0_i32, %c0_i32_0 : i32, i32
  }
  func.func @transform_2(%arg0: i32) -> (i32, i32) {
    %c0_i32 = arith.constant 0 : i32
    %c0_i32_0 = arith.constant 0 : i32
    %c0_i32_1 = arith.constant 0 : i32
    return %c0_i32, %c0_i32_0 : i32, i32
  }
  func.func @transform_3(%arg0: i32) -> (i32, i32) {
    %c0_i32 = arith.constant 0 : i32
    %c0_i32_0 = arith.constant 0 : i32
    %c0_i32_1 = arith.constant 0 : i32
    return %c0_i32, %c0_i32_0 : i32, i32
  }
  func.func @transform_4(%arg0: i32) -> (i32, i32) {
    %c0_i32 = arith.constant 0 : i32
    %c0_i32_0 = arith.constant 0 : i32
    %c0_i32_1 = arith.constant 0 : i32
    return %c0_i32, %c0_i32_0 : i32, i32
  }
  func.func @transform_5(%arg0: i32) -> (i32, i32) {
    %c0_i32 = arith.constant 0 : i32
    %c0_i32_0 = arith.constant 0 : i32
    %c0_i32_1 = arith.constant 0 : i32
    return %c0_i32, %c0_i32_0 : i32, i32
  }
  func.func @transform_6(%arg0: i32) -> (i32, i32) {
    %c0_i32 = arith.constant 0 : i32
    %c0_i32_0 = arith.constant 0 : i32
    %c0_i32_1 = arith.constant 0 : i32
    return %c0_i32, %c0_i32_0 : i32, i32
  }
  func.func @transform_7(%arg0: i32) -> (i32, i32) {
    %c0_i32 = arith.constant 0 : i32
    %c0_i32_0 = arith.constant 0 : i32
    %c0_i32_1 = arith.constant 0 : i32
    return %c0_i32, %c0_i32_0 : i32, i32
  }
  func.func @transform_8(%arg0: i32) -> (i32, i32) {
    %c0_i32 = arith.constant 0 : i32
    %c0_i32_0 = arith.constant 0 : i32
    %c0_i32_1 = arith.constant 0 : i32
    return %c0_i32, %c0_i32_0 : i32, i32
  }
  func.func @transform_9(%arg0: i32) -> (i32, i32) {
    %c0_i32 = arith.constant 0 : i32
    %c0_i32_0 = arith.constant 0 : i32
    return %c0_i32, %arg0 : i32, i32
  }
}

</mosaic_0001>

<bundles_post_ra>
// kernel: tpu_custom_call.1
= control target key start
LH: loop header
LB: loop body
LE: loop exit
PB: predicated region body
PF: predicated region fallthrough
CT: control target
= control target key end

     0   :  { %vm63_vm0 = vcmask 130048   ;;  %v757_v4 = vmov 0   ;;  %s942_s0 = inlined_call_operand.vmem [shape: f32[16,128], index: 0, kind: input, shape index: {}]   ;;  %s943_s1 = inlined_call_operand.vmem [shape: f32[32,16], index: 1, kind: input, shape index: {}]   ;;  %s944_s2 = inlined_call_operand.vmem [shape: f32[32,1], index: 2, kind: input, shape index: {}]   ;;  %s945_s3 = inlined_call_operand.vmem [shape: f32[32,32], index: 3, kind: input, shape index: {}]   ;;  %s946_s4 = inlined_call_operand.vmem [shape: f32[32,1], index: 4, kind: input, shape index: {}]   ;;  %s947_s5 = inlined_call_operand.vmem [shape: f32[40,32], index: 5, kind: input, shape index: {}]   ;;  %s948_s6 = inlined_call_operand.vmem [shape: f32[40,1], index: 6, kind: input, shape index: {}]   ;;  %s949_s7 = inlined_call_operand.vmem [shape: f32[16,40], index: 7, kind: input, shape index: {}]   ;;  %s950_s8 = inlined_call_operand.vmem [shape: f32[16,1], index: 8, kind: input, shape index: {}]   ;;  %s951_s9 = inlined_call_operand.hbm [shape: f32[16,128], index: 9, kind: output, shape index: {}]  }
   0x1   :  { %v33_v0 = vld [vmem:[%s942_s0] sm:$0xff]  ;;  %v34_v1 = vld [vmem:[%s942_s0 + $0x8] sm:$0xff]  ;;  %731 = vset.pattern.permute.xlu0 %v757_v4  ;;  %732 = vset.pattern.permute.xlu1 %v757_v4  ;;  %v41_v6 = vld [vmem:[%s944_s2 + $0x10] sm:$0xff] }
   0x2   :  { %v35_v2 = vld [vmem:[%s943_s1] sm:$0xff]  ;;  %v698_v3 = vpack.c.bf16 %v34_v1, %v33_v0  ;;  %v36_v7 = vld [vmem:[%s943_s1 + $0x8] sm:$0xff]  ;;  %55 = vperm.xlu1 %732, %v41_v6   ;;  %v37_v9 = vld [vmem:[%s943_s1 + $0x10] sm:$0xff] }
   0x3   :  { %642 = vmatprep.mubr.msk.f32.mxu1 %vm63_vm0, %v35_v2  ;;  %v39_v5 = vld [vmem:[%s944_s2] sm:$0xff]  ;;  %v40_v8 = vld [vmem:[%s944_s2 + $0x8] sm:$0xff]  ;;  %v42_v10 = vld [vmem:[%s944_s2 + $0x18] sm:$0xff] }
   0x4   :  { %699 = vmatprep.subr.bf16.mxu1 %v698_v3  ;;  %45 = vperm.xlu0 %731, %v39_v5  }
   0x5   :  { %701 = vmatpush3.bf16.msra.mxu1 %v698_v3 }
   0x8   :  { %643 = vmatmul.mubr.msk.f32.vlgmr.msra.gmra.mrb[0].mxu1 %vm63_vm0, %v36_v7  ;;  %50 = vperm.xlu0 %731, %v40_v8  }
   0x9   :  { %14 = vsyncpa [#allocation3], 0  ;;  %645 = vmatprep.mubr.msk.f32.mxu1 %vm63_vm0, %v37_v9  ;;  %v38_v11 = vld [vmem:[%s943_s1 + $0x18] sm:$0xff]  ;;  %v173_v12 = vld [vmem:[%s946_s4] sm:$0xff]  ;;  %60 = vperm.xlu1 %732, %v42_v10   ;;  %vm197_vm1 = vcmask 261120   ;;  %v758_v49 = vmov 0.0|0.0  }
   0xa   :  { %v174_v13 = vld [vmem:[%s946_s4 + $0x8] sm:$0xff]  ;;  %v175_v14 = vld [vmem:[%s946_s4 + $0x10] sm:$0xff]  ;;  %v176_v15 = vld [vmem:[%s946_s4 + $0x18] sm:$0xff]  ;;  %710 = vmatprep.subr.bf16.mxu0 %v758_v49  ;;  %vm759_vm2 = vmmov 0   ;;  %v760_v50 = vmov 0.0   ;;  %vm493_vm3 = vcmask 326656  }
   0xb   :  { %v308_v16 = vld [vmem:[%s948_s6] sm:$0xff]  ;;  %v309_v17 = vld [vmem:[%s948_s6 + $0x8] sm:$0xff]  ;;  %v310_v18 = vld [vmem:[%s948_s6 + $0x10] sm:$0xff]  ;;  %670 = vmatprep.mubr.msk.f32.mxu0 %vm759_vm2, %v760_v50  ;;  %s761_s19 = smov [#allocation2]  }
   0xc   :  { %646 = vmatmul.mubr.msk.f32.gmra.mrb[2].mxu1 %vm63_vm0, %v38_v11  ;;  %179 = vperm.xlu0 %731, %v173_v12   ;;  %v311_v19 = vld [vmem:[%s948_s6 + $0x18] sm:$0xff]  ;;  %v312_v20 = vld [vmem:[%s948_s6 + $0x20] sm:$0xff]  ;;  %v482_v22 = vld [vmem:[%s950_s8 + $0x8] sm:$0xff]  ;;  %s582_s4 = sshll.u32 %s761_s19, 4  ;;  %s583_s4 = int_to_ptr.vmem [resolvable:$true] %s582_s4 }
   0xd   :  { %184 = vperm.xlu1 %732, %v174_v13   ;;  %v481_v21 = vld [vmem:[%s950_s8] sm:$0xff]  ;;  %v170_v46 = vld [vmem:[%s945_s3 + $0x8] sm:$0xff]  ;;  %v171_v47 = vld [vmem:[%s945_s3 + $0x10] sm:$0xff]  ;;  %s733_s20 = scalar_lea.vmem %s583_s4, 256  ;;  %p738_p1 = scmp.lt.s32.totalorder %s583_s4, %s583_s4 }
   0xe   :  { %v169_v23 = vld [vmem:[%s945_s3] sm:$0xff]  ;;  %v172_v48 = vld [vmem:[%s945_s3 + $0x18] sm:$0xff]  ;;  %v304_v10 = vld [vmem:[%s947_s5 + $0x8] sm:$0xff]  ;;  %p734_p0 = scmp.ne.s32.totalorder %s583_s4, %s733_s20  ;;  %p739_p2 = scmp.lt.s32.totalorder %s733_s20, %s733_s20 }
   0xf   :  { %656 = vmatprep.mubr.msk.f32.mxu1 %vm197_vm1, %v169_v23  ;;  %v303_v9 = vld [vmem:[%s947_s5] sm:$0xff]  ;;  %v305_v11 = vld [vmem:[%s947_s5 + $0x10] sm:$0xff]  ;;  %v306_v12 = vld [vmem:[%s947_s5 + $0x18] sm:$0xff] }
  0x10   :  { %189 = vperm.xlu0 %731, %v175_v14   ;;  %v307_v13 = vld [vmem:[%s947_s5 + $0x20] sm:$0xff]  ;;  %p740_p3 = por %p739_p2, %p738_p1 }
  0x11   :  { %194 = vperm.xlu1 %732, %v176_v15   ;;  %v479_v14 = vld [vmem:[%s949_s7] sm:$0xff]  ;;  %v443_v15 = vlaneseq }
  0x12   :  { %p741_p4 = pnand %p740_p3, %p734_p0 }
  0x14   :  { %315 = vperm.xlu0 %731, %v308_v16  }
  0x15   :  { %320 = vperm.xlu1 %732, %v309_v17  }
  0x18   :  { %325 = vperm.xlu0 %731, %v310_v18  }
  0x19   :  { %330 = vperm.xlu1 %732, %v311_v19  }
  0x1c   :  { %335 = vperm.xlu0 %731, %v312_v20  }
  0x1d   :  { %485 = vperm.xlu1 %732, %v481_v21   ;;  %v444_v21 = vshrl.u32 %v443_v15, 7 }
  0x1f   :  { %vm449_vm4 = vcmp.ge.s32.totalorder %v444_v21, 1 }
  0x20   :  { %490 = vperm.xlu0 %731, %v482_v22  }
  0x81   :  { %v56_v25 = vpop.permute.xlu1 %55 }
  0x83   :  { %v46_v24 = vpop.permute.xlu0 %45 }
  0x87   :  { %v51_v26 = vpop.permute.xlu0 %50 }
  0x88   :  { %v61_v32 = vpop.permute.xlu1 %60 }
  0x8b   :  { %v180_v52 = vpop.permute.xlu0 %179 }
  0x8c   :  { %v185_v51 = vpop.permute.xlu1 %184 }
  0x8f   :  { %v190_v61 = vpop.permute.xlu0 %189 }
  0x90   :  { %v195_v58 = vpop.permute.xlu1 %194 }
  0x93   :  { %v316_v16 = vpop.permute.xlu0 %315 }
  0x94   :  { %v321_v22 = vpop.permute.xlu1 %320 }
  0xdb   :  { %v644_v27 = vpop.f32.mrb[0].mxu1 }
  0xdc   :  { %v148_v28 = vadd.f32 %v644_v27, %v51_v26  ;;  %v142_v29 = vpop.f32.mrb[1].mxu1 }
  0xdd   :  { %v143_v30 = vadd.f32 %v142_v29, %v46_v24 }
  0xde   :  { %v162_v31 = vmul.f32 0.1, %v148_v28 }
  0xdf   :  { %v161_v33 = vmul.f32 0.1, %v143_v30  ;;  %v647_v34 = vpop.f32.mrb[2].mxu1 }
  0xe0   :  { %v166_v35 = vmax.f32 %v148_v28, %v162_v31  ;;  %v158_v36 = vadd.f32 %v647_v34, %v61_v32  ;;  %v152_v37 = vpop.f32.mrb[3].mxu1  ;;  %v326_v28 = vpop.permute.xlu0 %325 }
  0xe1   :  { %v165_v38 = vmax.f32 %v143_v30, %v161_v33  ;;  %v153_v39 = vadd.f32 %v152_v37, %v56_v25 }
  0xe2   :  { %v164_v40 = vmul.f32 0.1, %v158_v36 }
  0xe3   :  { %v163_v41 = vmul.f32 0.1, %v153_v39  ;;  %v702_v42 = vpack.c.bf16 %v166_v35, %v165_v38  ;;  %v331_v35 = vpop.permute.xlu1 %330 }
  0xe4   :  { %v168_v43 = vmax.f32 %v158_v36, %v164_v40 }
  0xe5   :  { %v167_v44 = vmax.f32 %v153_v39, %v163_v41  ;;  %703 = vmatprep.subr.bf16.mxu1 %v702_v42  ;;  %v336_v41 = vpop.permute.xlu0 %335 }
  0xe6   :  { %705 = vmatpush3.bf16.msra.mxu1 %v702_v42 }
  0xe7   :  { %v706_v45 = vpack.c.bf16 %v168_v43, %v167_v44 }
  0xe9   :  { %707 = vmatprep.subr.bf16.mxu1 %v706_v45 }
  0xea   :  { %709 = vmatpush3.bf16.msra.mxu1 %v706_v45 }
  0xed   :  { %657 = vmatmul.mubr.msk.f32.vlgmr.msra.gmra.mrb[4].mxu1 %vm197_vm1, %v170_v46 }
  0xee   :  { %659 = vmatprep.mubr.msk.f32.mxu1 %vm197_vm1, %v171_v47 }
  0xf1   :  { %660 = vmatmul.mubr.msk.f32.gmra.mrb[6].mxu1 %vm197_vm1, %v172_v48 }
  0xf2   :  { %695 = vmatprep.mubr.msk.f32.mxu1 %vm493_vm3, %v479_v14 }
 0x1c0   :  { %v658_v53 = vpop.f32.mrb[4].mxu1 }
 0x1c1   :  { %v282_v54 = vadd.f32 %v658_v53, %v185_v51  ;;  %v276_v55 = vpop.f32.mrb[5].mxu1  ;;  %v491_v51 = vpop.permute.xlu0 %490 }
 0x1c2   :  { %v277_v56 = vadd.f32 %v276_v55, %v180_v52  ;;  %v486_v53 = vpop.permute.xlu1 %485 }
 0x1c3   :  { %v296_v57 = vmul.f32 0.1, %v282_v54 }
 0x1c4   :  { %v295_v59 = vmul.f32 0.1, %v277_v56  ;;  %v661_v60 = vpop.f32.mrb[6].mxu1 }
 0x1c5   :  { %v300_v62 = vmax.f32 %v282_v54, %v296_v57  ;;  %v292_v63 = vadd.f32 %v661_v60, %v195_v58  ;;  %v286_v0 = vpop.f32.mrb[7].mxu1 }
 0x1c6   :  { %v299_v1 = vmax.f32 %v277_v56, %v295_v59  ;;  %v287_v2 = vadd.f32 %v286_v0, %v190_v61 }
 0x1c7   :  { %v298_v3 = vmul.f32 0.1, %v292_v63 }
 0x1c8   :  { %v297_v4 = vmul.f32 0.1, %v287_v2  ;;  %v711_v5 = vpack.c.bf16 %v300_v62, %v299_v1 }
 0x1c9   :  { %v302_v6 = vmax.f32 %v292_v63, %v298_v3 }
 0x1ca   :  { %v301_v7 = vmax.f32 %v287_v2, %v297_v4  ;;  %712 = vmatpush3.bf16.msra.mxu0 %v711_v5 }
 0x1cb   :  { %713 = vmatprep.subr.bf16.mxu0 %v758_v49 }
 0x1cc   :  { %v714_v8 = vpack.c.bf16 %v302_v6, %v301_v7 }
 0x1ce   :  { %715 = vmatpush3.bf16.msra.mxu0 %v714_v8 }
 0x1d1   :  { %671 = vmatmul.mubr.msk.f32.vlgmr.msra.gmra.mrb[0].mxu0 %vm197_vm1, %v303_v9 }
 0x1d2   :  { %673 = vmatprep.mubr.msk.f32.mxu0 %vm759_vm2, %v760_v50 }
 0x1d5   :  { %674 = vmatmul.mubr.msk.f32.gmra.mrb[2].mxu0 %vm197_vm1, %v304_v10 }
 0x1d6   :  { %676 = vmatprep.mubr.msk.f32.mxu0 %vm759_vm2, %v760_v50 }
 0x1d9   :  { %677 = vmatmul.mubr.msk.f32.gmra.mrb[4].mxu0 %vm197_vm1, %v305_v11 }
 0x1da   :  { %679 = vmatprep.mubr.msk.f32.mxu0 %vm759_vm2, %v760_v50 }
 0x1dd   :  { %680 = vmatmul.mubr.msk.f32.gmra.mrb[6].mxu0 %vm197_vm1, %v306_v12 }
 0x1de   :  { %682 = vmatprep.mubr.msk.f32.mxu0 %vm759_vm2, %v760_v50  ;;  %v480_v50 = vld [vmem:[%s949_s7 + $0x8] sm:$0xff] }
 0x1e1   :  { %683 = vmatmul.mubr.msk.f32.gmra.mrb[8].mxu0 %vm197_vm1, %v307_v13 }
 0x2a4   :  { %v419_v17 = vpop.f32.mrb[0].mxu0 }
 0x2a5   :  { %v420_v18 = vadd.f32 %v419_v17, %v316_v16  ;;  %v672_v19 = vpop.f32.mrb[1].mxu0 }
 0x2a7   :  { %v454_v20 = vmul.f32 0.1, %v420_v18 }
 0x2a8   :  { %v424_v23 = vpop.f32.mrb[2].mxu0 }
 0x2a9   :  { %v425_v24 = vadd.f32 %v424_v23, %v321_v22  ;;  %v675_v25 = vpop.f32.mrb[3].mxu0  ;;  %v459_v26 = vmax.f32 %v420_v18, %v454_v20 }
 0x2ab   :  { %v455_v27 = vmul.f32 0.1, %v425_v24  ;;  %v474_v33 = vsel %vm449_vm4, %v459_v26, %v420_v18 }
 0x2ac   :  { %v429_v29 = vpop.f32.mrb[4].mxu0 }
 0x2ad   :  { %v460_v30 = vmax.f32 %v425_v24, %v455_v27  ;;  %v430_v31 = vadd.f32 %v429_v29, %v326_v28  ;;  %v678_v32 = vpop.f32.mrb[5].mxu0 }
 0x2af   :  { %v716_v34 = vpack.c.bf16 %v460_v30, %v474_v33  ;;  %v456_v37 = vmul.f32 0.1, %v430_v31 }
 0x2b0   :  { %v434_v36 = vpop.f32.mrb[6].mxu0 }
 0x2b1   :  { %v435_v38 = vadd.f32 %v434_v36, %v331_v35  ;;  %v681_v39 = vpop.f32.mrb[7].mxu0  ;;  %717 = vmatprep.subr.bf16.mxu1 %v716_v34  ;;  %v461_v43 = vmax.f32 %v430_v31, %v456_v37 }
 0x2b2   :  { %719 = vmatpush3.bf16.msra.mxu1 %v716_v34 }
 0x2b3   :  { %v457_v40 = vmul.f32 0.1, %v435_v38 }
 0x2b4   :  { %v439_v42 = vpop.f32.mrb[8].mxu0 }
 0x2b5   :  { %v462_v44 = vmax.f32 %v435_v38, %v457_v40  ;;  %v440_v45 = vadd.f32 %v439_v42, %v336_v41  ;;  %v684_v46 = vpop.f32.mrb[9].mxu0 }
 0x2b7   :  { %v458_v47 = vmul.f32 0.1, %v440_v45  ;;  %v720_v48 = vpack.c.bf16 %v462_v44, %v461_v43 }
 0x2b9   :  { %v463_v49 = vmax.f32 %v440_v45, %v458_v47  ;;  %721 = vmatprep.subr.bf16.mxu1 %v720_v48 }
 0x2ba   :  { %723 = vmatpush3.bf16.msra.mxu1 %v720_v48 }
 0x2bb   :  { %693 = vmatprep.subr.mxu1 %v463_v49 }
 0x2be   :  { %694 = vmatpush3.msra.mxu1 %v463_v49 }
 0x2bf   :  { %696 = vmatmul.mubr.msk.f32.vlgmr.msra.gmra.mrb[8].mxu1 %vm493_vm3, %v480_v50 }
 0x392   :  { %v697_v52 = vpop.f32.mrb[8].mxu1 }
 0x393   :  { %v572_v54 = vadd.f32 %v697_v52, %v491_v51  ;;  %v566_v55 = vpop.f32.mrb[9].mxu1 }
 0x394   :  { %v567_v56 = vadd.f32 %v566_v55, %v486_v53 }
 0x395   :  { %576 = vst [vmem:[#allocation2 + $0x8] sm:$0xff] %v572_v54 }
 0x396   :  { %575 = vst [vmem:[#allocation2] sm:$0xff] %v567_v56 }
 0x397   :  { %744 = shalt.err (!%p741_p4)
}
 0x398   :  { %s745_s22 = scalar_lea.hbm %s951_s9, 256 }
 0x399   :  { %p746_p5 = scmp.ne.s32.totalorder %s951_s9, %s745_s22  ;;  %p749_p6 = scmp.lt.u32.totalorder %s745_s22, %s951_s9 }
 0x39b   :  { %p751_p7 = pnand %p749_p6, %p746_p5 }
 0x39d   :  { %754 = shalt.err (!%p751_p7)
}
 0x39e   :  { %s762_s6 = smov 128   ;;  %s763_s8 = smov 8  }
 0x39f   :  { %588 = dma.vmem_to_hbm [thread:$0]  %s583_s4, 256, %s951_s9, [#allocation3], %s762_s6, %s762_s6, %s763_s8  }
 0x3a0   :  { %755 = dma.done.wait [#allocation3], 256  }
 0x3a1   :  { %756 = vsyncadd [#allocation3], 4294967040 }
 0x3a2   :  { %592 = vsyncpa [#allocation3], 1 }

</bundles_post_ra>
